<compile_context>
chip_gen: v7x
topology: tpu7x:2x2x1
jax: 0.10.0
libtpu: 0.0.40
codegen_flags: <defaults>
</compile_context>

<pallas_src>
import jax
import jax.numpy as jnp
from jax.experimental import pallas as pl
from jax.experimental.pallas import tpu as pltpu


def _unflatten_copy_kernel(x_ref, o_ref):
    # Identity copy of the current (rows, lanes) tile.  All reshaping is
    # metadata-only and handled in the wrapper.
    o_ref[...] = x_ref[...]


# Per-tile byte budget.  Pallas double-buffers input and output, so the VMEM
# footprint is ~4x this value (12 MiB), which fits under the default scoped
# VMEM limit on every generation (v5e: 16 MiB, v6e/v7x: 32 MiB) and well under
# v7x's 64 MiB physical VMEM.
_PER_TILE_BUDGET_BYTES = 3 * 1024 * 1024


def _identity_copy_2d(x2d: jax.Array) -> jax.Array:
    """Tiled, double-buffered, output-aliased identity copy of a 2-D array."""
    R, C = x2d.shape
    itemsize = jnp.dtype(x2d.dtype).itemsize
    # Sublane multiple: f32 -> 8, bf16 -> 16, int8/fp8 -> 32.
    sub = max(8, 32 // itemsize)

    row_bytes = max(C * itemsize, 1)
    budget_rows = max(sub, (_PER_TILE_BUDGET_BYTES // row_bytes) // sub * sub)
    # Largest tile that fits the budget; if the whole array fits, use one block
    # (full dims trivially satisfy the (8,128) tiling rule).
    tr = R if R <= budget_rows else budget_rows

    return pl.pallas_call(
        _unflatten_copy_kernel,
        out_shape=jax.ShapeDtypeStruct((R, C), x2d.dtype),
        grid=(pl.cdiv(R, tr),),
        in_specs=[pl.BlockSpec((tr, C), lambda i: (i, 0))],
        out_specs=pl.BlockSpec((tr, C), lambda i: (i, 0)),
        # Alias output onto input: no second HBM buffer for what is logically
        # an in-place identity op.
        input_output_aliases={0: 0},
        compiler_params=pltpu.CompilerParams(
            # Row axis is embarrassingly parallel -> shards across both
            # TensorCores on v7x; harmless no-op on single-TC v5e/v6e.
            dimension_semantics=("parallel",),
        ),
    )(x2d)


def unflatten(x: jax.Array, channels: int) -> jax.Array:
    """Pallas equivalent of UnFlatten(channels).forward(x).

    x: (B, channels) (or any flat tensor with B*channels elements)
    returns: (B, channels, 1, 1)
    """
    B = x.shape[0]
    total = x.size
    assert total == B * channels, (
        f"UnFlatten: expected {B * channels} elements, got {total}"
    )

    # TODO(synk): in production this whole function should be a bare
    # `x.reshape(B, channels, 1, 1)` (pure metadata view, zero HBM traffic);
    # the kernel below is kept only to provide an explicit Pallas boundary.

    # Lane-dense repack: if channels is narrower than a vreg lane row (128) but
    # the flat size folds evenly into 128-wide rows, copy that slab instead so
    # stores are unmasked full-lane vst (not vst.msk partial stores).
    if channels % 128 == 0:
        copy_shape = (total // channels, channels)
    elif total % 128 == 0:
        copy_shape = (total // 128, 128)
    else:
        copy_shape = (B, total // B)

    out = _identity_copy_2d(x.reshape(copy_shape))

    # (rows, lanes) -> (B, channels, 1, 1): pure metadata reshape in the
    # wrapper, matching torch .view semantics on a contiguous tensor.
    return out.reshape(B, channels, 1, 1)


if __name__ == "__main__":
    key = jax.random.PRNGKey(0)

    # Case 1: shape consistent with the module's forward (flat (B, channels)).
    B, channels = 2, 32
    x = jax.random.normal(key, (B, channels), dtype=jnp.float32)
    y = unflatten(x, channels)
    jax.block_until_ready(y)
    assert y.shape == (B, channels, 1, 1), y.shape
    assert y.dtype == x.dtype
    assert bool(jnp.all(y == x.reshape(B, channels, 1, 1)))

    # Case 2: lane-aligned channels (exercises the natural (B, C) copy path).
    B2, C2 = 64, 256
    x2 = jax.random.normal(jax.random.PRNGKey(1), (B2, C2), dtype=jnp.float32)
    y2 = unflatten(x2, C2)
    jax.block_until_ready(y2)
    assert y2.shape == (B2, C2, 1, 1)
    assert bool(jnp.all(y2 == x2.reshape(B2, C2, 1, 1)))

    # Case 3: narrow channels that fold into a lane-dense (rows, 128) slab.
    B3, C3 = 16, 32
    x3 = jax.random.normal(jax.random.PRNGKey(2), (B3, C3), dtype=jnp.float32)
    y3 = unflatten(x3, C3)
    jax.block_until_ready(y3)
    assert y3.shape == (B3, C3, 1, 1)
    assert bool(jnp.all(y3 == x3.reshape(B3, C3, 1, 1)))

    print("KERNEL_OK")
</pallas_src>

<mosaic_0001>
module attributes {stable_mosaic.version = 11 : i64} {
  func.func @_unflatten_copy_kernel(%arg0: i32, %arg1: memref<2x32xf32, #tpu.memory_space<vmem>>, %arg2: memref<2x32xf32, #tpu.memory_space<vmem>>) attributes {dimension_semantics = [#tpu.dimension_semantics<parallel>], iteration_bounds = array<i64: 1>, scalar_prefetch = 0 : i64, scratch_operands = 0 : i64, tpu.core_type = #tpu.core_type<tc>, window_params = [{transform_indices = @transform_0, window_bounds = array<i64: 2, 32>}, {transform_indices = @transform_1, window_bounds = array<i64: 2, 32>}]} {
    %c0 = arith.constant 0 : index
    %c0_0 = arith.constant 0 : index
    %0 = vector.load %arg1[%c0, %c0_0] : memref<2x32xf32, #tpu.memory_space<vmem>>, vector<2x32xf32>
    %c0_1 = arith.constant 0 : index
    %c0_2 = arith.constant 0 : index
    %1 = vector.load %arg2[%c0_1, %c0_2] : memref<2x32xf32, #tpu.memory_space<vmem>>, vector<2x32xf32>
    tpu.vector_store %arg2[%c0_1, %c0_2], %0 {strides = array<i32>} : memref<2x32xf32, #tpu.memory_space<vmem>>, vector<2x32xf32>,
    return
  }
  func.func @transform_0(%arg0: i32) -> (i32, i32) {
    %c0_i32 = arith.constant 0 : i32
    %c0_i32_0 = arith.constant 0 : i32
    return %arg0, %c0_i32 : i32, i32
  }
  func.func @transform_1(%arg0: i32) -> (i32, i32) {
    %c0_i32 = arith.constant 0 : i32
    %c0_i32_0 = arith.constant 0 : i32
    return %arg0, %c0_i32 : i32, i32
  }
}

</mosaic_0001>

<bundles_post_ra>
// kernel: tpu_custom_call.1
= control target key start
LH: loop header
LB: loop body
LE: loop exit
PB: predicated region body
PF: predicated region fallthrough
CT: control target
= control target key end

     0   :  { %6 = vsyncpa [#allocation3], 0  ;;  %s125_s0 = inlined_call_operand.hbm [shape: f32[2,32], index: 0, kind: input, shape index: {}, may-alias: {0,1}]   ;;  %s126_s1 = inlined_call_operand.hbm [shape: f32[2,32], index: 1, kind: output, shape index: {}, may-alias: {0,1}]  }
   0x1   :  { %7 = vsyncpa [#allocation4], 0  ;;  %s89_s6 = smov [#allocation2]   ;;  %s41_s10 = scalar_lea.hbm %s125_s0, 32 }
   0x2   :  { %s14_s7 = sshll.u32 %s89_s6, 4  ;;  %p42_p0 = scmp.ne.s32.totalorder %s125_s0, %s41_s10  ;;  %s15_s7 = int_to_ptr.vmem [resolvable:$true] %s14_s7 }
   0x3   :  { %p45_p1 = scmp.lt.u32.totalorder %s41_s10, %s125_s0 }
   0x5   :  { %p47_p2 = pnand %p45_p1, %p42_p0 }
   0x7   :  { %50 = shalt.err (!%p47_p2)
}
   0x8   :  { %s51_s15 = scalar_lea.vmem %s15_s7, 32  ;;  %p56_p4 = scmp.lt.s32.totalorder %s15_s7, %s15_s7 }
   0x9   :  { %p52_p3 = scmp.ne.s32.totalorder %s15_s7, %s51_s15  ;;  %p57_p5 = scmp.lt.s32.totalorder %s51_s15, %s51_s15 }
   0xb   :  { %p58_p6 = por %p57_p5, %p56_p4 }
   0xd   :  { %p59_p7 = pnand %p58_p6, %p52_p3 }
   0xf   :  { %62 = shalt.err (!%p59_p7)
}
  0x10   :  { %17 = dma.hbm_to_vmem [thread:$0]  %s125_s0, 32, %s15_s7, [#allocation3]  }
  0x11   :  { %85 = dma.done.wait [#allocation3], 32  }
  0x12   :  { %86 = vsyncadd [#allocation3], 4294967264  ;;  %s90_s18 = smov [#allocation5]   ;;  %vm22_vm0 = vcmask 254976   ;;  %v21_v0 = vld [vmem:[#allocation2] sm:$0x3] }
  0x13   :  { %s30_s19 = sshll.u32 %s90_s18, 4  ;;  %23 = vst.msk [vmem:[#allocation5] sm:$0x3] %vm22_vm0, %v21_v0  ;;  %s31_s19 = int_to_ptr.vmem [resolvable:$true] %s30_s19 }
  0x14   :  { %s63_s20 = scalar_lea.vmem %s31_s19, 32  ;;  %p68_p9 = scmp.lt.s32.totalorder %s31_s19, %s31_s19 }
  0x15   :  { %p64_p8 = scmp.ne.s32.totalorder %s31_s19, %s63_s20  ;;  %p69_p10 = scmp.lt.s32.totalorder %s63_s20, %s63_s20 }
  0x17   :  { %p70_p11 = por %p69_p10, %p68_p9 }
  0x19   :  { %p71_p12 = pnand %p70_p11, %p64_p8 }
  0x1b   :  { %74 = shalt.err (!%p71_p12)
}
  0x1c   :  { %s75_s23 = scalar_lea.hbm %s126_s1, 32 }
  0x1d   :  { %p76_p13 = scmp.ne.s32.totalorder %s126_s1, %s75_s23  ;;  %p79_p0 = scmp.lt.u32.totalorder %s75_s23, %s126_s1 }
  0x1f   :  { %p81_p1 = pnand %p79_p0, %p76_p13 }
  0x21   :  { %84 = shalt.err (!%p81_p1)
}
  0x22   :  { %33 = dma.vmem_to_hbm [thread:$0]  %s31_s19, 32, %s126_s1, [#allocation4]  }
  0x23   :  { %87 = dma.done.wait [#allocation4], 32  }
  0x24   :  { %88 = vsyncadd [#allocation4], 4294967264 }
  0x25   :  { %37 = vsyncpa [#allocation3], 1 }
  0x26   :  { %38 = vsyncpa [#allocation4], 1 }

</bundles_post_ra>
